<compile_context>
chip_gen: v6e
topology: v6e:2x2x1
jax: 0.10.0
libtpu: 0.0.40
codegen_flags: <defaults>
</compile_context>

<pallas_src>
import functools

import jax
import jax.numpy as jnp
from jax.experimental import pallas as pl
from jax.experimental.pallas import tpu as pltpu


def _round_up(x, m):
    return (x + m - 1) // m * m


# --------------------------------------------------------------------------
# Kernel 1: weight streamer.  y = s_bf16 @ [W3 | u1 | 0pad] + [b3 | beta | 0]
# Grid = (nj column splits "parallel", nk reduction tiles "arbitrary").
# f32 accumulator resident in VMEM scratch; weights stream in bf16.
# --------------------------------------------------------------------------
def _stream_matmul_kernel(s_ref, w_ref, b_ref, y_ref, acc_ref):
    k = pl.program_id(1)

    @pl.when(k == 0)
    def _():
        acc_ref[...] = jnp.zeros_like(acc_ref)

    acc_ref[...] += jnp.dot(s_ref[...], w_ref[...],
                            preferred_element_type=jnp.float32)

    @pl.when(k == pl.num_programs(1) - 1)
    def _():
        y_ref[...] = acc_ref[...] + b_ref[...]


# --------------------------------------------------------------------------
# Kernel 2: tiny tail.  Columns [0, H) of y are the W3 head (-> sigma),
# column H carries s@u1 + sum(circ*b1+a) (the collapsed mu branch), columns
# > H are padding.  z = (sum_b y[b,H] + sum_{h<H} exp(y)*eps) / (B*H);
# out = par2 + z * par1, written as a lane-dense (R, 128) slab.
# --------------------------------------------------------------------------
def _tail_kernel(y_ref, eps_ref, p1_ref, p2_ref, o_ref, *, h, inv_n):
    y = y_ref[...]
    col = jax.lax.broadcasted_iota(jnp.int32, y.shape, dimension=1)
    valid = col < h
    sigma = jnp.exp(jnp.where(valid, y, 0.0))          # mask BEFORE exp
    se_sum = jnp.sum(jnp.where(valid, sigma * eps_ref[...], 0.0))
    mu_sum = jnp.sum(jnp.where(col == h, y, 0.0))       # the u1 column
    z = (mu_sum + se_sum) * inv_n
    o_ref[...] = p2_ref[...] + z * p1_ref[...]


# --------------------------------------------------------------------------
# Parameters (deterministic init; matches nn.Linear uniform(-1/sqrt(D),..) and
# the explicit ones/zeros parameters of the module).
# --------------------------------------------------------------------------
def init_params(key, d_in, hid, d_dec):
    k1, k2, k3, k4 = jax.random.split(key, 4)
    bound = float(1.0 / (d_in ** 0.5))
    return dict(
        w1=jax.random.uniform(k1, (d_in, hid), jnp.float32, -bound, bound),
        b1=jax.random.uniform(k2, (hid,), jnp.float32, -bound, bound),
        w3=jax.random.uniform(k3, (d_in, hid), jnp.float32, -bound, bound),
        b3=jax.random.uniform(k4, (hid,), jnp.float32, -bound, bound),
        circ=jnp.ones((hid,), jnp.float32),      # Encoder.circ
        a=jnp.zeros((hid,), jnp.float32),        # Encoder.a
        par1=jnp.ones((d_dec,), jnp.float32),    # Decoder.par1
        par2=jnp.zeros((d_dec,), jnp.float32),   # Decoder.par2
    )


# --------------------------------------------------------------------------
# One-time pre-pack.
#   tk : reduction tile (512 for small demo; 2048 for the real size).
#   nj : column splits of the streamed weight (1 on v5e/v6e; 2 on v7x so both
#        TensorCores stream half of W3).
# Invariant: padded weight rows/cols are exactly 0 so padded activations are
# inert (load-bearing -- keep it if the pack scheme ever changes).
# --------------------------------------------------------------------------
def prepack_params(params, *, tk=512, nj=1):
    d_in, hid = params["w1"].shape
    d_dec = params["par1"].shape[0]
    hw = _round_up(hid + 1, 128 * nj)     # W3 cols + 1 spare col for u1
    dpad = _round_up(d_in, tk)
    rows = _round_up(pl.cdiv(d_dec, 128), 8)   # lane-dense (rows, 128) output

    # Collapsed W1 branch: u1 = W1 @ circ (f32), beta = sum(circ*b1 + a).
    u1 = jnp.dot(params["w1"].astype(jnp.float32),
                 params["circ"].astype(jnp.float32))            # (d_in,)
    beta = jnp.sum(params["circ"] * params["b1"] + params["a"])  # scalar

    w_p = (jnp.zeros((dpad, hw), jnp.bfloat16)
           .at[:d_in, :hid].set(params["w3"].astype(jnp.bfloat16))
           .at[:d_in, hid].set(u1.astype(jnp.bfloat16)))
    b_p = (jnp.zeros((1, hw), jnp.float32)
           .at[0, :hid].set(params["b3"])
           .at[0, hid].set(beta))

    par1_2d = jnp.zeros((rows * 128,), jnp.float32).at[:d_dec].set(
        params["par1"]).reshape(rows, 128)
    par2_2d = jnp.zeros((rows * 128,), jnp.float32).at[:d_dec].set(
        params["par2"]).reshape(rows, 128)

    return dict(
        w=w_p, b=b_p, par1=par1_2d, par2=par2_2d,
        d_in=d_in, hid=hid, d_dec=d_dec,
        hw=hw, dpad=dpad, rows=rows, tk=tk, nj=nj,
    )


# --------------------------------------------------------------------------
# Wrapper: hoisted sigmoid + bf16 cast, per-call activation padding only.
# --------------------------------------------------------------------------
def autoencoder_forward(x, packed, eps):
    B = x.shape[0]
    D, H, D_dec = packed["d_in"], packed["hid"], packed["d_dec"]
    HW, Dpad, R = packed["hw"], packed["dpad"], packed["rows"]
    tk, nj = packed["tk"], packed["nj"]
    tn = HW // nj
    nk = Dpad // tk

    # sigmoid + bf16 cast hoisted out of the kernel.  Padded columns stay 0,
    # and the corresponding (zero) weight rows keep them inert anyway.
    s = jax.nn.sigmoid(x.astype(jnp.float32)).astype(jnp.bfloat16)
    s_p = jnp.zeros((B, Dpad), jnp.bfloat16).at[:, :D].set(s)

    # Per-generation VMEM budget derived from the actual tile sizes
    # (double-buffered weight/x/bias/output tiles + resident accumulator).
    vmem_limit = int(min(
        100 * 2**20,
        2 * (tk * tn * 2 + B * tk * 2 + B * tn * 4 + tn * 4)
        + B * tn * 4 + 8 * 2**20))

    y = pl.pallas_call(
        _stream_matmul_kernel,
        out_shape=jax.ShapeDtypeStruct((B, HW), jnp.float32),
        grid_spec=pltpu.PrefetchScalarGridSpec(
            num_scalar_prefetch=0,
            grid=(nj, nk),
            in_specs=[
                pl.BlockSpec((B, tk), lambda j, k: (0, k)),
                # (sweep pipeline_mode=pl.Buffered(3) here once tk is raised)
                pl.BlockSpec((tk, tn), lambda j, k: (k, j)),
                pl.BlockSpec((1, tn), lambda j, k: (0, j)),
            ],
            out_specs=pl.BlockSpec((B, tn), lambda j, k: (0, j)),
            scratch_shapes=[pltpu.VMEM((B, tn), jnp.float32)],
        ),
        compiler_params=pltpu.CompilerParams(
            dimension_semantics=("parallel", "arbitrary"),
            vmem_limit_bytes=vmem_limit),
    )(s_p, packed["w"], packed["b"])

    eps_p = jnp.zeros((B, HW), jnp.float32).at[:, :H].set(
        eps.astype(jnp.float32))

    out2d = pl.pallas_call(
        functools.partial(_tail_kernel, h=H, inv_n=1.0 / float(B * H)),
        out_shape=jax.ShapeDtypeStruct((R, 128), jnp.float32),
        grid_spec=pltpu.PrefetchScalarGridSpec(
            num_scalar_prefetch=0,
            grid=(1,),
            in_specs=[
                pl.BlockSpec((B, HW), lambda i: (0, 0)),
                pl.BlockSpec((B, HW), lambda i: (0, 0)),
                pl.BlockSpec((R, 128), lambda i: (0, 0)),
                pl.BlockSpec((R, 128), lambda i: (0, 0)),
            ],
            out_specs=pl.BlockSpec((R, 128), lambda i: (0, 0)),
        ),
    )(y, eps_p, packed["par1"], packed["par2"])

    return out2d.reshape(-1)[:D_dec]


# --------------------------------------------------------------------------
# References.
#   * reference_forward_matched mirrors the kernel's quantization exactly
#     (bf16 s/W3/u1 on the MXU, f32 accumulation, W1 collapsed to u1).
#   * reference_forward_f32 is the straight f32 translation of the module.
# --------------------------------------------------------------------------
def reference_forward_matched(x, params, eps):
    s_bf = jax.nn.sigmoid(x.astype(jnp.float32)).astype(jnp.bfloat16)
    w3_bf = params["w3"].astype(jnp.bfloat16)
    u1_bf = jnp.dot(params["w1"], params["circ"]).astype(jnp.bfloat16)
    beta = jnp.sum(params["circ"] * params["b1"] + params["a"])
    y3 = jnp.dot(s_bf, w3_bf, preferred_element_type=jnp.float32) + params["b3"]
    sigma = jnp.exp(y3)
    mu_col = jnp.dot(s_bf, u1_bf, preferred_element_type=jnp.float32)   # (B,)
    B, H = eps.shape
    z = (jnp.sum(mu_col) + B * beta + jnp.sum(sigma * eps)) / (B * H)
    return params["par2"] + z * params["par1"]


def reference_forward_f32(x, params, eps):
    s = jax.nn.sigmoid(x.astype(jnp.float32))
    y1 = s @ params["w1"] + params["b1"]
    y3 = s @ params["w3"] + params["b3"]
    sigma = jnp.exp(y3)
    mu = params["circ"] * y1 + params["a"]
    z = jnp.mean(mu + sigma * eps)
    return params["par2"] + z * params["par1"]


if __name__ == "__main__":
    # Scaled-down, shape-compatible stand-ins for the module's hard-coded
    # 195*179*3 -> 3500 dims.  The same code handles the full size; there use
    # tk=2048, nj=1 on v5e/v6e and nj=2 on v7x (both TensorCores).
    B = 2
    D_IN = 20 * 17 * 3          # flattened feature dim (1020)
    HID = 300                   # hidden width (3500 in the original)
    D_DEC = D_IN                # decoder parameter length

    key = jax.random.PRNGKey(0)
    k_param, k_x, k_eps = jax.random.split(key, 3)

    params = init_params(k_param, D_IN, HID, D_DEC)
    packed = prepack_params(params, tk=512, nj=1)   # one-time prepack

    x = jax.random.normal(k_x, (B, D_IN), jnp.float32)
    # Reparameterization noise (torch.distributions.Normal(0,1).sample):
    eps = jax.random.normal(k_eps, (B, HID), jnp.float32)

    out = jax.block_until_ready(autoencoder_forward(x, packed, eps))
    assert out.shape == (D_DEC,)

    ref_m = reference_forward_matched(x, params, eps)
    ref_f = reference_forward_f32(x, params, eps)
    assert jnp.allclose(out, ref_m, rtol=2e-3, atol=2e-3), (
        f"matched-ref max abs err = {jnp.max(jnp.abs(out - ref_m))}")
    assert jnp.allclose(out, ref_f, rtol=1e-2, atol=1e-2), (
        f"f32-ref max abs err = {jnp.max(jnp.abs(out - ref_f))}")

    print("KERNEL_OK")
</pallas_src>

<mosaic_0001>
module attributes {stable_mosaic.version = 11 : i64} {
  func.func @_stream_matmul_kernel(%arg0: i32, %arg1: i32, %arg2: memref<2x512xbf16, #tpu.memory_space<vmem>>, %arg3: memref<512x384xbf16, #tpu.memory_space<vmem>>, %arg4: memref<1x384xf32, #tpu.memory_space<vmem>>, %arg5: memref<2x384xf32, #tpu.memory_space<vmem>>, %arg6: memref<2x384xf32, #tpu.memory_space<vmem>>) attributes {dimension_semantics = [#tpu.dimension_semantics<parallel>, #tpu.dimension_semantics<arbitrary>], iteration_bounds = array<i64: 1, 2>, scalar_prefetch = 0 : i64, scratch_operands = 1 : i64, tpu.core_type = #tpu.core_type<tc>, window_params = [{transform_indices = @transform_0, window_bounds = array<i64: 2, 512>}, {transform_indices = @transform_1, window_bounds = array<i64: 512, 384>}, {transform_indices = @transform_2, window_bounds = array<i64: 1, 384>}, {transform_indices = @transform_3, window_bounds = array<i64: 2, 384>}]} {
    %c0_i32 = arith.constant 0 : i32
    %0 = arith.cmpi eq, %arg1, %c0_i32 : i32
    %1 = arith.extui %0 : i1 to i32
    %c0_i32_0 = arith.constant 0 : i32
    %2 = arith.cmpi ne, %1, %c0_i32_0 : i32
    scf.if %2 {
      %cst_9 = arith.constant 0.000000e+00 : f32
      %12 = vector.broadcast %cst_9 : f32 to vector<2x384xf32>
      %c0_10 = arith.constant 0 : index
      %c0_11 = arith.constant 0 : index
      %13 = vector.load %arg6[%c0_10, %c0_11] : memref<2x384xf32, #tpu.memory_space<vmem>>, vector<2x384xf32>
      tpu.vector_store %arg6[%c0_10, %c0_11], %12 {strides = array<i32>} : memref<2x384xf32, #tpu.memory_space<vmem>>, vector<2x384xf32>,
    } else {
    }
    %c0 = arith.constant 0 : index
    %c0_1 = arith.constant 0 : index
    %3 = vector.load %arg6[%c0, %c0_1] : memref<2x384xf32, #tpu.memory_space<vmem>>, vector<2x384xf32>
    %c0_2 = arith.constant 0 : index
    %c0_3 = arith.constant 0 : index
    %4 = vector.load %arg2[%c0_2, %c0_3] : memref<2x512xbf16, #tpu.memory_space<vmem>>, vector<2x512xbf16>
    %c0_4 = arith.constant 0 : index
    %c0_5 = arith.constant 0 : index
    %5 = vector.load %arg3[%c0_4, %c0_5] : memref<512x384xbf16, #tpu.memory_space<vmem>>, vector<512x384xbf16>
    %cst = arith.constant dense<0.000000e+00> : vector<2x384xf32>
    %6 = tpu.matmul %4, %5, %cst {dimension_numbers = #tpu.dot_dimension_numbers<[1], [0], [0], [1], [0, 0, 1, 1], [], []>} : vector<2x512xbf16>, vector<512x384xbf16>, vector<2x384xf32> -> vector<2x384xf32>
    %7 = arith.addf %3, %6 : vector<2x384xf32>
    %c0_6 = arith.constant 0 : index
    %c0_7 = arith.constant 0 : index
    %8 = vector.load %arg6[%c0_6, %c0_7] : memref<2x384xf32, #tpu.memory_space<vmem>>, vector<2x384xf32>
    tpu.vector_store %arg6[%c0_6, %c0_7], %7 {strides = array<i32>} : memref<2x384xf32, #tpu.memory_space<vmem>>, vector<2x384xf32>,
    %c1_i32 = arith.constant 1 : i32
    %9 = arith.cmpi eq, %arg1, %c1_i32 : i32
    %10 = arith.extui %9 : i1 to i32
    %c0_i32_8 = arith.constant 0 : i32
    %11 = arith.cmpi ne, %10, %c0_i32_8 : i32
    scf.if %11 {
      %c0_9 = arith.constant 0 : index
      %c0_10 = arith.constant 0 : index
      %12 = vector.load %arg6[%c0_9, %c0_10] : memref<2x384xf32, #tpu.memory_space<vmem>>, vector<2x384xf32>
      %c0_11 = arith.constant 0 : index
      %c0_12 = arith.constant 0 : index
      %13 = vector.load %arg4[%c0_11, %c0_12] : memref<1x384xf32, #tpu.memory_space<vmem>>, vector<1x384xf32>
      %14 = vector.broadcast %13 : vector<1x384xf32> to vector<2x384xf32>
      %15 = arith.addf %12, %14 : vector<2x384xf32>
      %c0_13 = arith.constant 0 : index
      %c0_14 = arith.constant 0 : index
      %16 = vector.load %arg5[%c0_13, %c0_14] : memref<2x384xf32, #tpu.memory_space<vmem>>, vector<2x384xf32>
      tpu.vector_store %arg5[%c0_13, %c0_14], %15 {strides = array<i32>} : memref<2x384xf32, #tpu.memory_space<vmem>>, vector<2x384xf32>,
    } else {
    }
    return
  }
  func.func @transform_0(%arg0: i32, %arg1: i32) -> (i32, i32) {
    %c0_i32 = arith.constant 0 : i32
    %c0_i32_0 = arith.constant 0 : i32
    return %c0_i32, %arg1 : i32, i32
  }
  func.func @transform_1(%arg0: i32, %arg1: i32) -> (i32, i32) {
    %c0_i32 = arith.constant 0 : i32
    return %arg1, %arg0 : i32, i32
  }
  func.func @transform_2(%arg0: i32, %arg1: i32) -> (i32, i32) {
    %c0_i32 = arith.constant 0 : i32
    %c0_i32_0 = arith.constant 0 : i32
    return %c0_i32, %arg0 : i32, i32
  }
  func.func @transform_3(%arg0: i32, %arg1: i32) -> (i32, i32) {
    %c0_i32 = arith.constant 0 : i32
    %c0_i32_0 = arith.constant 0 : i32
    return %c0_i32, %arg0 : i32, i32
  }
}

</mosaic_0001>

<bundles_post_ra>
// kernel: tpu_custom_call.1
= control target key start
LH: loop header
LB: loop body
LE: loop exit
PB: predicated region body
PF: predicated region fallthrough
CT: control target
= control target key end

     0   :  { %8 = vsyncpa [#allocation4], 0  ;;  %s2064_s0 = inlined_call_operand.hbm [shape: bf16[2,1024], index: 0, kind: input, shape index: {}]   ;;  %s2065_s1 = inlined_call_operand.hbm [shape: bf16[1024,384], index: 1, kind: input, shape index: {}]   ;;  %s2066_s2 = inlined_call_operand.vmem [shape: f32[1,384], index: 2, kind: input, shape index: {}]   ;;  %s2067_s3 = inlined_call_operand.hbm [shape: f32[2,384], index: 3, kind: output, shape index: {}]  }
   0x1   :  { %10 = vsyncpa [#allocation4 + $0x1], 0 }
   0x2   :  { %11 = vsyncpa [#allocation7], 0 }
   0x3   :  { %13 = vsyncpa [#allocation7 + $0x1], 0 }
   0x4   :  { %14 = vsyncpa [#allocation5], 0  ;;  %s1799_s12 = smov 0   ;;  %s1801_s13 = smov 0  }
   0x5   :  { %s1803_s14 = smov 0   ;;  %s1805_s15 = smov 0  }
   0x6   :  { %s1807_s16 = smov 0   ;;  %s1809_s17 = smov 0  }
   0x7 LB: > { %s1268_s18 = sadd.s32 4294967295, %s1769_s17   ;;  %s29_s19 = sadd.s32 1, %s1765_s16  ;;  %s1769_s17 = sphi %s1809_s17, %s20_s17   ;;  %s1765_s16 = sphi %s1807_s16, %s2077_s16   ;;  %s1761_s15 = sphi %s1805_s15, %s2076_s15   ;;  %s1757_s14 = sphi %s1803_s14, %s2075_s14   ;;  %s1753_s13 = sphi %s1801_s13, %s2074_s13   ;;  %s1749_s12 = sphi %s1799_s12, %s2073_s12  }
   0x8   : > { %p30_p0 = scmp.ge.s32.totalorder %s29_s19, 2  ;;  %s39_s20 = sadd.s32 1, %s1757_s14 }
   0x9   : > { %p46_p1 = scmp.ne.s32.totalorder %s1757_s14, %s1753_s13  ;;  %p47_p2 = scmp.eq.s32.totalorder %s1769_s17, 0 }
   0xa   : > { %s2079_s19 = smov (%p30_p0, %s29_s19), 0  ;;  %p52_p4 = scmp.ne.s32.totalorder %s1753_s13, %s1749_s12 }
   0xb   : > { %p1835_p3 = por %p47_p2, %p46_p1  ;;  %s36_s22 = ssub.s32 %s1765_s16, %s2079_s19 }
   0xc   : > { %p53_p5 = scmp.eq.s32.totalorder %s1268_s18, 0  ;;  %p37_p6 = scmp.eq.s32.totalorder %s36_s22, 0 }
   0xd   : > { %p1446_p8 = scmp.lt.s32.totalorder %s1769_s17, 2  ;;  %s1853_s25 = sand.u32 1, %s1757_s14  }
   0xe   : > { %p1844_p7 = por %p53_p5, %p52_p4  ;;  %s1383_s26 = sshll.u32 %s1765_s16, 6 }
   0xf   : > { %s1850_s24 = scalar_select %p37_p6, %s1757_s14, %s39_s20  }
  0x10   : > { %s1272_s27 = sshll.u32 %s1853_s25, 2  ;;  %s174_s30 = scalar_lea.hbm %s2064_s0, %s1383_s26 }
  0x11   : > { %s168_s4 = scalar_lea.vmem [#allocation3], %s1272_s27  ;;  %p1862_p9 = pnand %p1446_p8, %p1835_p3 }
  0x12   : > { %s176_s5 = sshll.u32 %s168_s4, 4  ;;  %p1278_p10 = scmp.ge.s32.totalorder %s1769_s17, 1  ;;  %s177_s5 = int_to_ptr.vmem [resolvable:$true] %s176_s5 }
  0x13   : > { %p205_p11 = scmp.lt.s32.totalorder %s1769_s17, 3  ;;  %s165_s7 = scalar_lea.sflag [#allocation4], %s1853_s25 }
  0x14   : > { %p1633_p12 = pneg %p1862_p9  ;;  %s1644_s8 = scalar_lea.vmem %s177_s5, 64 }
  0x15   : > { %p1645_p13 = scmp.ne.s32.totalorder %s177_s5, %s1644_s8  ;;  %s1771_s9 = smov [#allocation3]  }
  0x16   : > { %s1649_s10 = sshll.u32 %s1771_s9, 4  ;;  %s1650_s10 = int_to_ptr.vmem [resolvable:$false] %s1649_s10 }
  0x17   : > { %p1647_p0 = pnand %p1645_p13, %p1633_p12  ;;  %s1651_s11 = scalar_lea.vmem %s1650_s10, 128 }
  0x18   : > { %p1652_p2 = scmp.lt.s32.totalorder %s177_s5, %s1650_s10  ;;  %p1653_p3 = scmp.lt.s32.totalorder %s1651_s11, %s1644_s8 }
  0x19   : > { %p1648_p1 = pneg %p1647_p0 }
  0x1a   : > { %p1654_p4 = por %p1653_p3, %p1652_p2 }
  0x1c   : > { %p1655_p5 = pnand %p1654_p4, %p1648_p1 }
  0x1e   : > { %1658 = shalt.err (!%p1655_p5)
}
  0x1f   : > { %1442 = dma.hbm_to_vmem [thread:$0]  (!%p1862_p9), %s174_s30, 64, %s177_s5, %s165_s7  }
  0x20   : > { %p1880_p6 = pnand %p1278_p10, %p205_p11  ;;  %s1428_s20 = smul.u32 768, %s1853_s25 }
  0x21   : > { %s1429_s21 = smul.u32 12288, %s1765_s16  ;;  %s184_s4 = scalar_lea.sflag [#allocation7], %s1853_s25 }
  0x22   : > { %s187_s28 = scalar_lea.vmem [#allocation6], %s1428_s20  ;;  %s1772_s30 = smov [#allocation6]  }
  0x23   : > { %s196_s27 = scalar_lea.hbm %s2065_s1, %s1429_s21  ;;  %s197_s29 = sshll.u32 %s187_s28, 4  ;;  %s198_s29 = int_to_ptr.vmem [resolvable:$true] %s197_s29 }
  0x24   : > { %s1672_s8 = scalar_lea.vmem %s198_s29, 12288  ;;  %s1677_s5 = sshll.u32 %s1772_s30, 4  ;;  %s1678_s5 = int_to_ptr.vmem [resolvable:$false] %s1677_s5 }
  0x25   : > { %p1673_p8 = scmp.ne.s32.totalorder %s198_s29, %s1672_s8  ;;  %s1679_s7 = scalar_lea.vmem %s1678_s5, 24576 }
  0x26   : > { %p1680_p10 = scmp.lt.s32.totalorder %s198_s29, %s1678_s5  ;;  %p1681_p11 = scmp.lt.s32.totalorder %s1679_s7, %s1672_s8 }
  0x27   : > { %p1675_p13 = pnand %p1673_p8, %p1633_p12 }
  0x28   : > { %p1682_p1 = por %p1681_p11, %p1680_p10 }
  0x29   : > { %p1676_p0 = pneg %p1675_p13 }
  0x2b   : > { %p1683_p2 = pnand %p1682_p1, %p1676_p0 }
  0x2d   : > { %1686 = shalt.err (!%p1683_p2)
}
  0x2e   : > { %s1773_s9 = smov 192   ;;  %s1774_s10 = smov 12  }
  0x2f   : > { %1445 = dma.hbm_to_vmem [thread:$0]  (!%p1862_p9), %s196_s27, 12288, %s198_s29, %s184_s4, %s1773_s9, %s1773_s9, %s1774_s10  }
  0x30   : > { %209 = sbr.rel (%p1880_p6) target bundleno = 399 (0x18f), region = 32  ;;  %s211_s25 = sand.u32 (!%p1880_p6), 1, %s1753_s13  }
  0x31   : > { %s1279_s11 = sshll.u32 (!%p1880_p6), %s211_s25, 2  ;;  %s212_s20 = scalar_lea.sflag (!%p1880_p6), [#allocation4], %s211_s25 }
  0x32   : > { %s1898_s21 = scalar_lea.vmem (!%p1880_p6), [#allocation3], %s1279_s11 }
  0x35   : > { %1736 = dma.done.wait (%p1844_p7), %s212_s20, 64  }
  0x36   : > { %1738 = vsyncadd (%p1844_p7), %s212_s20, 4294967232  ;;  %s1430_s22 = smul.u32 768, %s211_s25  ;;  %s221_s26 = scalar_lea.sflag [#allocation7], %s211_s25 }
  0x38   : > { %s1904_s6 = scalar_lea.vmem [#allocation6], %s1430_s22 }
  0x39   : > { %1740 = dma.done.wait (%p1844_p7), %s221_s26, 12288  }
  0x3a   : > { %1742 = vsyncadd (%p1844_p7), %s221_s26, 4294955008  ;;  %p1280_p9 = scmp.ne.s32.totalorder %s1761_s15, 0 }
  0x3c   : > { %264 = sbr.rel (%p1280_p9) target bundleno = 67 (0x43), region = 44 }
  0x41   : > { %v1775_v0 = vmov 0.0  }
  0x42   : > { %265 = vst [vmem:[#allocation2] sm:$0x3f] %v1775_v0 }
  0x43 PF: > { %v1503_v1 = vld [vmem:[%s1904_s6 + $0xac] ss:$12 sps:$4 sm:$0xff]   ;;  %v1507_v3 = vld [vmem:[%s1904_s6 + $0xa8] ss:$12 sps:$4 sm:$0xff]   ;;  %v1513_v7 = vld [vmem:[%s1904_s6 + $0x90] ss:$12 sps:$4 sm:$0xff]   ;;  %v408_v41 = vlaneseq }
  0x44   : > { %v1505_v2 = vld [vmem:[%s1904_s6 + $0x22c] ss:$12 sps:$4 sm:$0xff]   ;;  %937 = vmatprep.subr.bf16.mxu0 %v1503_v1  ;;  %v1508_v4 = vld [vmem:[%s1904_s6 + $0x228] ss:$12 sps:$4 sm:$0xff]   ;;  %v1514_v8 = vld [vmem:[%s1904_s6 + $0x210] ss:$12 sps:$4 sm:$0xff]  }
  0x45   : > { %978 = vmatprep.subr.bf16.mxu1 %v1505_v2  ;;  %v1509_v5 = vld [vmem:[%s1904_s6 + $0x94] ss:$12 sps:$4 sm:$0xff]   ;;  %938 = vmatpush1.bf16.msra.mxu0 %v1507_v3  ;;  %v1515_v9 = vld [vmem:[%s1904_s6 + $0x7c] ss:$12 sps:$4 sm:$0xff]   ;;  %v1519_v11 = vld [vmem:[%s1904_s6 + $0x78] ss:$12 sps:$4 sm:$0xff]  }
  0x46   : > { %979 = vmatpush1.bf16.msra.mxu1 %v1508_v4  ;;  %v1511_v6 = vld [vmem:[%s1904_s6 + $0x214] ss:$12 sps:$4 sm:$0xff]   ;;  %939 = vmatprep.subr.bf16.mxu0 %v1509_v5  ;;  %v1517_v10 = vld [vmem:[%s1904_s6 + $0x1fc] ss:$12 sps:$4 sm:$0xff]   ;;  %v1520_v12 = vld [vmem:[%s1904_s6 + $0x1f8] ss:$12 sps:$4 sm:$0xff]  }
  0x47   : > { %980 = vmatprep.subr.bf16.mxu1 %v1511_v6  ;;  %v1521_v13 = vld [vmem:[%s1904_s6 + $0x64] ss:$12 sps:$4 sm:$0xff]   ;;  %v1525_v15 = vld [vmem:[%s1904_s6 + $0x60] ss:$12 sps:$4 sm:$0xff]   ;;  %v1531_v19 = vld [vmem:[%s1904_s6 + $0x48] ss:$12 sps:$4 sm:$0xff]  }
  0x48   : > { %v1523_v14 = vld [vmem:[%s1904_s6 + $0x1e4] ss:$12 sps:$4 sm:$0xff]   ;;  %v1526_v16 = vld [vmem:[%s1904_s6 + $0x1e0] ss:$12 sps:$4 sm:$0xff]   ;;  %v1532_v20 = vld [vmem:[%s1904_s6 + $0x1c8] ss:$12 sps:$4 sm:$0xff]  }
  0x49   : > { %940 = vmatpush1.bf16.msra.mxu0 %v1513_v7  ;;  %v1527_v17 = vld [vmem:[%s1904_s6 + $0x4c] ss:$12 sps:$4 sm:$0xff]   ;;  %v1533_v21 = vld [vmem:[%s1904_s6 + $0x34] ss:$12 sps:$4 sm:$0xff]   ;;  %v1537_v23 = vld [vmem:[%s1904_s6 + $0x30] ss:$12 sps:$4 sm:$0xff]  }
  0x4a   : > { %981 = vmatpush1.bf16.msra.mxu1 %v1514_v8  ;;  %941 = vmatprep.subr.bf16.mxu0 %v1515_v9  ;;  %v1529_v18 = vld [vmem:[%s1904_s6 + $0x1cc] ss:$12 sps:$4 sm:$0xff]   ;;  %v1535_v22 = vld [vmem:[%s1904_s6 + $0x1b4] ss:$12 sps:$4 sm:$0xff]   ;;  %v1538_v24 = vld [vmem:[%s1904_s6 + $0x1b0] ss:$12 sps:$4 sm:$0xff]  }
  0x4b   : > { %982 = vmatprep.subr.bf16.mxu1 %v1517_v10  ;;  %v1539_v25 = vld [vmem:[%s1904_s6 + $0x1c] ss:$12 sps:$4 sm:$0xff]   ;;  %v1543_v27 = vld [vmem:[%s1904_s6 + $0x18] ss:$12 sps:$4 sm:$0xff]   ;;  %v1549_v31 = vld [vmem:[%s1904_s6] ss:$12 sps:$4 sm:$0xff]  }
  0x4c   : > { %v1541_v26 = vld [vmem:[%s1904_s6 + $0x19c] ss:$12 sps:$4 sm:$0xff]   ;;  %v1544_v28 = vld [vmem:[%s1904_s6 + $0x198] ss:$12 sps:$4 sm:$0xff]   ;;  %v1550_v32 = vld [vmem:[%s1904_s6 + $0x180] ss:$12 sps:$4 sm:$0xff]  }
  0x4d   : > { %942 = vmatpush1.bf16.msra.mxu0 %v1519_v11  ;;  %v1545_v29 = vld [vmem:[%s1904_s6 + $0x4] ss:$12 sps:$4 sm:$0xff]   ;;  %v1551_v33 = vld [vmem:[%s1904_s6 + $0x16c] ss:$12 sps:$4 sm:$0xff]   ;;  %v1555_v35 = vld [vmem:[%s1904_s6 + $0x168] ss:$12 sps:$4 sm:$0xff]  }
  0x4e   : > { %983 = vmatpush1.bf16.msra.mxu1 %v1520_v12  ;;  %943 = vmatprep.subr.bf16.mxu0 %v1521_v13  ;;  %v1547_v30 = vld [vmem:[%s1904_s6 + $0x184] ss:$12 sps:$4 sm:$0xff]   ;;  %v1553_v34 = vld [vmem:[%s1904_s6 + $0x2ec] ss:$12 sps:$4 sm:$0xff]   ;;  %v1556_v36 = vld [vmem:[%s1904_s6 + $0x2e8] ss:$12 sps:$4 sm:$0xff]  }
  0x4f   : > { %984 = vmatprep.subr.bf16.mxu1 %v1523_v14  ;;  %v1557_v37 = vld [vmem:[%s1904_s6 + $0x154] ss:$12 sps:$4 sm:$0xff]   ;;  %v1776_v39 = vmov 1966171168   ;;  %v1561_v42 = vld [vmem:[%s1904_s6 + $0x150] ss:$12 sps:$4 sm:$0xff]  }
  0x50   : > { %v1559_v38 = vld [vmem:[%s1904_s6 + $0x2d4] ss:$12 sps:$4 sm:$0xff]   ;;  %v406_v40 = vunpack.c.l.s4 %v1776_v39  ;;  %v1562_v43 = vld [vmem:[%s1904_s6 + $0x2d0] ss:$12 sps:$4 sm:$0xff]   ;;  %v1953_v47 = vshrl.u32 %v408_v41, 7  ;;  %p1378_p7 = scmp.ne.s32.totalorder %s1761_s15, 1 }
  0x51   : > { %944 = vmatpush1.bf16.msra.mxu0 %v1525_v15  ;;  %v1563_v44 = vld [vmem:[%s1904_s6 + $0x13c] ss:$12 sps:$4 sm:$0xff]   ;;  %v1567_v48 = vld [vmem:[%s1904_s6 + $0x138] ss:$12 sps:$4 sm:$0xff]   ;;  %v1573_v52 = vld [vmem:[%s1904_s6 + $0x120] ss:$12 sps:$4 sm:$0xff]  }
  0x52   : > { %985 = vmatpush1.bf16.msra.mxu1 %v1526_v16  ;;  %945 = vmatprep.subr.bf16.mxu0 %v1527_v17  ;;  %v1565_v45 = vld [vmem:[%s1904_s6 + $0x2bc] ss:$12 sps:$4 sm:$0xff]   ;;  %v407_v46 = vunpack.c.0.s8 %v406_v40  ;;  %v1568_v49 = vld [vmem:[%s1904_s6 + $0x2b8] ss:$12 sps:$4 sm:$0xff]   ;;  %v1574_v53 = vld [vmem:[%s1904_s6 + $0x2a0] ss:$12 sps:$4 sm:$0xff]  }
  0x53   : > { %986 = vmatprep.subr.bf16.mxu1 %v1529_v18  ;;  %v1569_v50 = vld [vmem:[%s1904_s6 + $0x124] ss:$12 sps:$4 sm:$0xff]   ;;  %v1281_v55 = vld.sshfl [vmem:[%s1898_s21] sm:$0x33 pattern:$0x75316420] }
  0x54   : > { %v1571_v51 = vld [vmem:[%s1904_s6 + $0x2a4] ss:$12 sps:$4 sm:$0xff]   ;;  %v410_v54 = vsub.s32 %v407_v46, %v1953_v47  ;;  %v1575_v56 = vld [vmem:[%s1904_s6 + $0x10c] ss:$12 sps:$4 sm:$0xff]   ;;  %v404_v57 = vcombine.high %v1281_v55, %v1281_v55  ;;  %v1579_v59 = vld [vmem:[%s1904_s6 + $0x108] ss:$12 sps:$4 sm:$0xff]  }
  0x55   : > { %946 = vmatpush1.bf16.msra.mxu0 %v1531_v19  ;;  %v1577_v58 = vld [vmem:[%s1904_s6 + $0x28c] ss:$12 sps:$4 sm:$0xff]   ;;  %v1580_v61 = vld [vmem:[%s1904_s6 + $0x288] ss:$12 sps:$4 sm:$0xff]   ;;  %v1585_v1 = vld [vmem:[%s1904_s6 + $0xf0] ss:$12 sps:$4 sm:$0xff]  }
  0x56   : > { %987 = vmatpush1.bf16.msra.mxu1 %v1532_v20  ;;  %947 = vmatprep.subr.bf16.mxu0 %v1533_v21  ;;  %v418_v60 = vrot.slane %v404_v57, %v410_v54  ;;  %v1581_v62 = vld [vmem:[%s1904_s6 + $0xf4] ss:$12 sps:$4 sm:$0xff]   ;;  %v1586_v2 = vld [vmem:[%s1904_s6 + $0x270] ss:$12 sps:$4 sm:$0xff]   ;;  %v1591_v5 = vld [vmem:[%s1904_s6 + $0xd8] ss:$12 sps:$4 sm:$0xff]   ;;  %v1979_v11 = vrot.slane %v1281_v55, %v410_v54 }
  0x57   : > { %988 = vmatprep.subr.bf16.mxu1 %v1535_v22  ;;  %v1583_v0 = vld [vmem:[%s1904_s6 + $0x274] ss:$12 sps:$4 sm:$0xff]   ;;  %v1587_v3 = vld [vmem:[%s1904_s6 + $0xdc] ss:$12 sps:$4 sm:$0xff]   ;;  %v1592_v6 = vld [vmem:[%s1904_s6 + $0x258] ss:$12 sps:$4 sm:$0xff]  }
  0x58   : > { %v420_v63 = vcombine.high %v418_v60, %v418_v60  ;;  %969 = vmatprep.mubr.bf16.mxu0 %v418_v60  ;;  %v1589_v4 = vld [vmem:[%s1904_s6 + $0x25c] ss:$12 sps:$4 sm:$0xff]   ;;  %v1593_v7 = vld [vmem:[%s1904_s6 + $0xc4] ss:$12 sps:$4 sm:$0xff]   ;;  %v1597_v9 = vld [vmem:[%s1904_s6 + $0xc0] ss:$12 sps:$4 sm:$0xff]   ;;  %v1986_v15 = vcombine.high %v1979_v11, %v1979_v11 }
  0x59   : > { %948 = vmatpush1.bf16.msra.mxu0 %v1537_v23  ;;  %v1595_v8 = vld [vmem:[%s1904_s6 + $0x244] ss:$12 sps:$4 sm:$0xff]   ;;  %v1598_v10 = vld [vmem:[%s1904_s6 + $0x240] ss:$12 sps:$4 sm:$0xff]   ;;  %v1627_v41 = vld [vmem:[%s1904_s6 + $0xc8] ss:$12 sps:$4 sm:$0xff]  }
  0x5a   : > { %989 = vmatpush1.bf16.msra.mxu1 %v1538_v24  ;;  %949 = vmatprep.subr.bf16.mxu0 %v1539_v25  ;;  %v1599_v12 = vld [vmem:[%s1904_s6 + $0x170] ss:$12 sps:$4 sm:$0xff]   ;;  %v1603_v17 = vld [vmem:[%s1904_s6 + $0x158] ss:$12 sps:$4 sm:$0xff]   ;;  %v1607_v21 = vld [vmem:[%s1904_s6 + $0x140] ss:$12 sps:$4 sm:$0xff]  }
  0x5b   : > { %990 = vmatprep.subr.bf16.mxu1 %v1541_v26  ;;  %1010 = vmatprep.mubr.bf16.mxu1 %v420_v63  ;;  %v1600_v13 = vld [vmem:[%s1904_s6 + $0x2f0] ss:$12 sps:$4 sm:$0xff]   ;;  %v1604_v18 = vld [vmem:[%s1904_s6 + $0x2d8] ss:$12 sps:$4 sm:$0xff]   ;;  %v1608_v22 = vld [vmem:[%s1904_s6 + $0x2c0] ss:$12 sps:$4 sm:$0xff]  }
  0x5c   : > { %v1601_v14 = vld [vmem:[%s1904_s6 + $0xb0] ss:$12 sps:$4 sm:$0xff]   ;;  %v1605_v19 = vld [vmem:[%s1904_s6 + $0x98] ss:$12 sps:$4 sm:$0xff]   ;;  %v1609_v23 = vld [vmem:[%s1904_s6 + $0x80] ss:$12 sps:$4 sm:$0xff]  }
  0x5d   : > { %950 = vmatpush1.bf16.msra.mxu0 %v1543_v27  ;;  %v1602_v16 = vld [vmem:[%s1904_s6 + $0x230] ss:$12 sps:$4 sm:$0xff]   ;;  %v1606_v20 = vld [vmem:[%s1904_s6 + $0x218] ss:$12 sps:$4 sm:$0xff]   ;;  %v1610_v24 = vld [vmem:[%s1904_s6 + $0x200] ss:$12 sps:$4 sm:$0xff]  }
  0x5e   : > { %991 = vmatpush1.bf16.msra.mxu1 %v1544_v28  ;;  %951 = vmatprep.subr.bf16.mxu0 %v1545_v29  ;;  %v1611_v25 = vld [vmem:[%s1904_s6 + $0x128] ss:$12 sps:$4 sm:$0xff]   ;;  %v1615_v29 = vld [vmem:[%s1904_s6 + $0x110] ss:$12 sps:$4 sm:$0xff]   ;;  %v1625_v39 = vld [vmem:[%s1904_s6 + $0x20] ss:$12 sps:$4 sm:$0xff]  }
  0x5f   : > { %992 = vmatprep.subr.bf16.mxu1 %v1547_v30  ;;  %v1612_v26 = vld [vmem:[%s1904_s6 + $0x2a8] ss:$12 sps:$4 sm:$0xff]   ;;  %v1616_v30 = vld [vmem:[%s1904_s6 + $0x290] ss:$12 sps:$4 sm:$0xff]   ;;  %v1626_v40 = vld [vmem:[%s1904_s6 + $0x1a0] ss:$12 sps:$4 sm:$0xff]  }
  0x60   : > { %v1613_v27 = vld [vmem:[%s1904_s6 + $0x68] ss:$12 sps:$4 sm:$0xff]   ;;  %v1777_v54 = vmov 1983009808  }
  0x61   : > { %952 = vmatpush1.bf16.msra.mxu0 %v1549_v31  ;;  %v1614_v28 = vld [vmem:[%s1904_s6 + $0x1e8] ss:$12 sps:$4 sm:$0xff]   ;;  %v1617_v31 = vld [vmem:[%s1904_s6 + $0x50] ss:$12 sps:$4 sm:$0xff]   ;;  %v1104_v55 = vunpack.c.l.s4 %v1777_v54 }
  0x62   : > { %993 = vmatpush1.bf16.msra.mxu1 %v1550_v32  ;;  %953 = vmatprep.subr.bf16.mxu0 %v1551_v33  ;;  %v1618_v32 = vld [vmem:[%s1904_s6 + $0x1d0] ss:$12 sps:$4 sm:$0xff]   ;;  %v1619_v33 = vld [vmem:[%s1904_s6 + $0xf8] ss:$12 sps:$4 sm:$0xff]  }
  0x63   : > { %994 = vmatprep.subr.bf16.mxu1 %v1553_v34  ;;  %v1620_v34 = vld [vmem:[%s1904_s6 + $0x278] ss:$12 sps:$4 sm:$0xff]  }
  0x65   : > { %954 = vmatpush2.bf16.msra.mxu0 %v1555_v35  ;;  %v1621_v35 = vld [vmem:[%s1904_s6 + $0x38] ss:$12 sps:$4 sm:$0xff]  }
  0x66   : > { %995 = vmatpush2.bf16.msra.mxu1 %v1556_v36  ;;  %955 = vmatprep.subr.bf16.mxu0 %v1557_v37  ;;  %v1622_v36 = vld [vmem:[%s1904_s6 + $0x1b8] ss:$12 sps:$4 sm:$0xff]   ;;  %v1623_v37 = vld [vmem:[%s1904_s6 + $0xe0] ss:$12 sps:$4 sm:$0xff]  }
  0x67   : > { %996 = vmatprep.subr.bf16.mxu1 %v1559_v38  ;;  %v1624_v38 = vld [vmem:[%s1904_s6 + $0x260] ss:$12 sps:$4 sm:$0xff]  }
  0x69   : > { %956 = vmatpush2.bf16.msra.mxu0 %v1561_v42  ;;  %v1628_v42 = vld [vmem:[%s1904_s6 + $0x248] ss:$12 sps:$4 sm:$0xff]  }
  0x6a   : > { %997 = vmatpush2.bf16.msra.mxu1 %v1562_v43  ;;  %957 = vmatprep.subr.bf16.mxu0 %v1563_v44  ;;  %v1629_v43 = vld [vmem:[%s1904_s6 + $0x8] ss:$12 sps:$4 sm:$0xff]  }
  0x6b   : > { %998 = vmatprep.subr.bf16.mxu1 %v1565_v45  ;;  %v1630_v44 = vld [vmem:[%s1904_s6 + $0x188] ss:$12 sps:$4 sm:$0xff]  }
  0x6d   : > { %958 = vmatpush2.bf16.msra.mxu0 %v1567_v48 }
  0x6e   : > { %999 = vmatpush2.bf16.msra.mxu1 %v1568_v49  ;;  %959 = vmatprep.subr.bf16.mxu0 %v1569_v50 }
  0x6f   : > { %1000 = vmatprep.subr.bf16.mxu1 %v1571_v51 }
  0x71   : > { %960 = vmatpush2.bf16.msra.mxu0 %v1573_v52 }
  0x72   : > { %1001 = vmatpush2.bf16.msra.mxu1 %v1574_v53  ;;  %961 = vmatprep.subr.bf16.mxu0 %v1575_v56 }
  0x73   : > { %1002 = vmatprep.subr.bf16.mxu1 %v1577_v58  ;;  %v1105_v58 = vunpack.c.0.s8 %v1104_v55 }
  0x75   : > { %962 = vmatpush2.bf16.msra.mxu0 %v1579_v59 }
  0x76   : > { %1003 = vmatpush2.bf16.msra.mxu1 %v1580_v61  ;;  %963 = vmatprep.subr.bf16.mxu0 %v1581_v62 }
  0x77   : > { %1004 = vmatprep.subr.bf16.mxu1 %v1583_v0  ;;  %v1108_v0 = vsub.s32 %v1105_v58, %v1953_v47 }
  0x79   : > { %964 = vmatpush2.bf16.msra.mxu0 %v1585_v1 }
  0x7a   : > { %1005 = vmatpush2.bf16.msra.mxu1 %v1586_v2  ;;  %965 = vmatprep.subr.bf16.mxu0 %v1587_v3 }
  0x7b   : > { %1006 = vmatprep.subr.bf16.mxu1 %v1589_v4 }
  0x7d   : > { %966 = vmatpush2.bf16.msra.mxu0 %v1591_v5 }
  0x7e   : > { %1007 = vmatpush2.bf16.msra.mxu1 %v1592_v6  ;;  %967 = vmatprep.subr.bf16.mxu0 %v1593_v7 }
  0x7f   : > { %1008 = vmatprep.subr.bf16.mxu1 %v1595_v8 }
  0x81   : > { %968 = vmatpush2.bf16.msra.mxu0 %v1597_v9 }
  0x82   : > { %1009 = vmatpush2.bf16.msra.mxu1 %v1598_v10  ;;  %1384 = vmatprep.subr.bf16.mxu0 %v1599_v12  ;;  %v266_v10 = vld [vmem:[#allocation2] sm:$0x3f] }
  0x83   : > { %1406 = vmatprep.subr.bf16.mxu1 %v1600_v13 }
  0x84   : > { %970 = vmatmul.mubr.bf16.vlgmr.msra.gmra.mxu0 %v1979_v11 }
  0x85   : > { %1011 = vmatmul.mubr.bf16.vlgmr.msra.gmra.mxu1 %v1986_v15  ;;  %1385 = vmatpush3.bf16.msra.mxu0 %v1601_v14 }
  0x86   : > { %1407 = vmatpush3.bf16.msra.mxu1 %v1602_v16  ;;  %1386 = vmatprep.subr.bf16.mxu0 %v1603_v17 }
  0x87   : > { %1408 = vmatprep.subr.bf16.mxu1 %v1604_v18  ;;  %1051 = vmatprep.mubr.bf16.mxu0 %v418_v60 }
  0x88   : > { %1091 = vmatprep.mubr.bf16.mxu1 %v420_v63 }
  0x89   : > { %1387 = vmatpush3.bf16.msra.mxu0 %v1605_v19 }
  0x8a   : > { %1409 = vmatpush3.bf16.msra.mxu1 %v1606_v20  ;;  %1388 = vmatprep.subr.bf16.mxu0 %v1607_v21 }
  0x8b   : > { %1410 = vmatprep.subr.bf16.mxu1 %v1608_v22 }
  0x8d   : > { %1389 = vmatpush3.bf16.msra.mxu0 %v1609_v23 }
  0x8e   : > { %1411 = vmatpush3.bf16.msra.mxu1 %v1610_v24  ;;  %1390 = vmatprep.subr.bf16.mxu0 %v1611_v25 }
  0x8f   : > { %1412 = vmatprep.subr.bf16.mxu1 %v1612_v26 }
  0x91   : > { %1391 = vmatpush3.bf16.msra.mxu0 %v1613_v27 }
  0x92   : > { %1413 = vmatpush3.bf16.msra.mxu1 %v1614_v28  ;;  %1392 = vmatprep.subr.bf16.mxu0 %v1615_v29 }
  0x93   : > { %1414 = vmatprep.subr.bf16.mxu1 %v1616_v30 }
  0x95   : > { %1393 = vmatpush3.bf16.msra.mxu0 %v1617_v31 }
  0x96   : > { %1415 = vmatpush3.bf16.msra.mxu1 %v1618_v32  ;;  %1394 = vmatprep.subr.bf16.mxu0 %v1619_v33 }
  0x97   : > { %1416 = vmatprep.subr.bf16.mxu1 %v1620_v34 }
  0x99   : > { %1395 = vmatpush3.bf16.msra.mxu0 %v1621_v35 }
  0x9a   : > { %1417 = vmatpush3.bf16.msra.mxu1 %v1622_v36  ;;  %1396 = vmatprep.subr.bf16.mxu0 %v1623_v37 }
  0x9b   : > { %1418 = vmatprep.subr.bf16.mxu1 %v1624_v38 }
  0x9d   : > { %1397 = vmatpush3.bf16.msra.mxu0 %v1625_v39 }
  0x9e   : > { %1419 = vmatpush3.bf16.msra.mxu1 %v1626_v40  ;;  %1398 = vmatprep.subr.bf16.mxu0 %v1627_v41 }
  0x9f   : > { %1420 = vmatprep.subr.bf16.mxu1 %v1628_v42 }
  0xa1   : > { %1399 = vmatpush3.bf16.msra.mxu0 %v1629_v43 }
  0xa2   : > { %1421 = vmatpush3.bf16.msra.mxu1 %v1630_v44 }
  0xa4   : > { %1052 = vmatmul.mubr.bf16.vlgmr.msra.gmra.mxu0 %v1979_v11 }
  0xa5   : > { %1092 = vmatmul.mubr.bf16.vlgmr.msra.gmra.mxu1 %v1986_v15 }
 0x144   : > { %v971_v45 = vpop.f32.mrf.mxu0 }
 0x145   : > { %v1012_v46 = vpop.f32.mrf.mxu1 }
 0x146   : > { %v973_v48 = vpop.f32.mrf.mxu0  ;;  %v1013_v56 = vadd.f32 %v1012_v46, %v971_v45 }
 0x147   : > { %v1014_v49 = vpop.f32.mrf.mxu1 }
 0x148   : > { %v975_v50 = vpop.f32.mrf.mxu0  ;;  %v1015_v57 = vadd.f32 %v1014_v49, %v973_v48 }
 0x149   : > { %v1016_v51 = vpop.f32.mrf.mxu1 }
 0x14a   : > { %v976_v52 = vpop.f32.mrf.mxu0  ;;  %v1102_v63 = vcombine.low %v1013_v56, %v1015_v57 }
 0x14b   : > { %v1017_v53 = vpop.f32.mrf.mxu1 }
 0x14c   : > { %v1109_v8 = vrot.slane %v1102_v63, %v1108_v0 }
 0x164   : > { %v1400_v59 = vpop.f32.mrf.mxu0 }
 0x165   : > { %v1422_v60 = vpop.f32.mrf.mxu1 }
 0x166   : > { %v1401_v61 = vpop.f32.mrf.mxu0 }
 0x167   : > { %v1423_v62 = vpop.f32.mrf.mxu1  ;;  %v1402_v1 = vadd.f32 %v1401_v61, %v1400_v59 }
 0x168   : > { %v1424_v2 = vadd.f32 %v1423_v62, %v1422_v60  ;;  %v1403_v3 = vpop.f32.mrf.mxu0 }
 0x169   : > { %v1425_v4 = vpop.f32.mrf.mxu1 }
 0x16a   : > { %v1094_v5 = vadd.f32 %v1424_v2, %v1402_v1  ;;  %v1404_v6 = vpop.f32.mrf.mxu0 }
 0x16b   : > { %v1426_v7 = vpop.f32.mrf.mxu1 }
 0x16c   : > { %v1116_v9 = vrot.slane %v1094_v5, %v1108_v0 }
 0x16e   : > { %v1117_v11 = vcombine.low %v1109_v8, %v1116_v9  ;;  %1124 = sbr.rel (%p1378_p7) target bundleno = 384 (0x180), region = 48 }
 0x170   : > { %v1119_v12 = vadd.f32 %v1117_v11, %v266_v10 }
 0x172   : > { %1120 = vst [vmem:[#allocation2] sm:$0x3f] %v1119_v12 }
 0x173   : > { %v1126_v13 = vld [vmem:[%s2066_s2] sm:$0x7]  ;;  %v1130_v14 = vsub.s32 0, %v1953_v47  ;;  %v1134_v15 = vsub.s32 1, %v1953_v47  ;;  %v1138_v16 = vsub.s32 2, %v1953_v47 }
 0x175   : > { %v1131_v17 = vrot.slane %v1126_v13, %v1130_v14  ;;  %v1135_v18 = vrot.slane %v1126_v13, %v1134_v15  ;;  %v1139_v19 = vrot.slane %v1126_v13, %v1138_v16 }
 0x177   : > { %v1140_v20 = vcombine.low %v1131_v17, %v1135_v18  ;;  %v1154_v21 = vrot.slane %v1139_v19, %v1108_v0 }
 0x179   : > { %v1147_v22 = vrot.slane %v1140_v20, %v1108_v0  ;;  %v1125_v23 = vld [vmem:[#allocation2] sm:$0x3f] }
 0x17b   : > { %v1155_v24 = vcombine.low %v1147_v22, %v1154_v21 }
 0x17d   : > { %v1157_v25 = vadd.f32 %v1155_v24, %v1125_v23 }
 0x17f   : > { %1158 = vst [vmem:[#allocation8] sm:$0x3f] %v1157_v25 }
 0x180 PF: > { %p2031_p12 = scmp.eq.s32.totalorder %s1268_s18, 1  ;;  %s1778_s27 = smov [#allocation8]  }
 0x181   : > { %s1169_s28 = sshll.u32 %s1778_s27, 4  ;;  %s1170_s28 = int_to_ptr.vmem [resolvable:$true] %s1169_s28 }
 0x182   : > { %s1687_s29 = scalar_lea.vmem %s1170_s28, 96  ;;  %p1694_p6 = scmp.lt.s32.totalorder %s1170_s28, %s1170_s28 }
 0x183   : > { %p1688_p3 = scmp.ne.s32.totalorder %s1170_s28, %s1687_s29  ;;  %p1695_p8 = scmp.lt.s32.totalorder %s1687_s29, %s1687_s29 }
 0x185   : > { %p1689_p4 = pnand %p1688_p3, %p2031_p12  ;;  %p1696_p13 = por %p1695_p8, %p1694_p6 }
 0x187   : > { %p1690_p5 = pneg %p1689_p4 }
 0x189   : > { %p1697_p0 = pnand %p1696_p13, %p1690_p5 }
 0x18b   : > { %1700 = shalt.err (!%p1697_p0)
}
 0x18c   : > { %1436 = dma.vmem_to_hbm [thread:$0]  (%p2031_p12), %s1170_s28, 96, %s2067_s3, [#allocation5]  }
 0x18d   : > { %1744 = dma.done.wait (%p2031_p12), [#allocation5], 96  }
 0x18e   : > { %1746 = vsyncadd (%p2031_p12), [#allocation5], 4294967200 }
 0x18f PF: > { %s20_s17 = sadd.s32 1, %s1769_s17   ;;  %s2073_s12 = smov %s1753_s13 }
 0x190   : > { %p17_p10 = scmp.ge.s32.totalorder %s20_s17, 4   ;;  %s2074_s13 = smov %s1757_s14 }
 0x191   : > { %s2075_s14 = smov %s1850_s24  ;;  %s2076_s15 = smov %s1765_s16 }
 0x192   : > { %s2077_s16 = smov %s2079_s19  ;;  %19 = sbr.rel (!%p17_p10) target bundleno = 7 (0x7), region = 94 }
 0x197   :  { %1182 = vsyncpa [#allocation4], 1 }
 0x198   :  { %1184 = vsyncpa [#allocation4 + $0x1], 1 }
 0x199   :  { %1185 = vsyncpa [#allocation7], 1 }
 0x19a   :  { %1187 = vsyncpa [#allocation7 + $0x1], 1 }
 0x19b   :  { %1188 = vsyncpa [#allocation5], 1 }
 0x19c   :  { %1190 = vsyncpa [#allocation5 + $0x1], 1 }

</bundles_post_ra>
